<compile_context>
chip_gen: v5e
topology: v5e:2x2
jax: 0.10.0
libtpu: 0.0.40
codegen_flags: <defaults>
</compile_context>

<pallas_src>
import jax
import jax.numpy as jnp
from jax.experimental import pallas as pl
from jax.experimental.pallas import tpu as pltpu


MAX_TILE_B = 512   # batch rows per grid step once the batch outgrows one tile


def _round_up(n, m):
    return ((n + m - 1) // m) * m


def mlp_kernel(x_ref, w1_ref, b1_ref, w2_ref, b2_ref, o_ref):
    # linear1: f32 matmul on the MXU (multi-pass), f32 bias add.
    z1 = jnp.dot(x_ref[...], w1_ref[...],
                 preferred_element_type=jnp.float32) + b1_ref[...]
    # linear2: chained f32 matmul + bias add.
    zout = jnp.dot(z1, w2_ref[...],
                   preferred_element_type=jnp.float32) + b2_ref[...]
    o_ref[...] = zout.astype(o_ref.dtype)


def net_model_forward(x, w1_t, b1, w2_t, b2):
    """x: [B, in] f32, w1_t: [in, hidden], b1: [1, hidden],
       w2_t: [hidden, out], b2: [1, out]  ->  [B, out] f32.
       Same math as PyTorch NetModel.forward (two chained Linear layers)."""
    B, K = x.shape
    H = w1_t.shape[1]
    O = w2_t.shape[1]

    # Pick the batch tile: one step if the batch fits, else 512-row tiles
    # (weights stay resident, only x / out stream per step).
    if B <= MAX_TILE_B:
        tile_b = _round_up(B, 8)
    else:
        tile_b = MAX_TILE_B
    Bp = _round_up(B, tile_b)
    if Bp != B:
        # Only the batch dim ever gets padded (cheap, and only when B is not
        # a multiple of the tile); feature dims are used at their true size.
        x = jnp.pad(x, ((0, Bp - B), (0, 0)))
    steps = Bp // tile_b

    cost = pl.CostEstimate(
        flops=2 * B * (K * H + H * O),
        transcendentals=0,
        bytes_accessed=4 * (B * K + K * H + H + H * O + O + B * O),
    )

    # One grid step -> "arbitrary" (it is just a single body invocation);
    # multiple steps -> "parallel" so multi-TC parts can shard the batch.
    # TODO(synk): on v7x, pltpu.CORE_PARALLEL on this axis (with an even
    # number of tiles) is what actually splits work across the two
    # TensorCores; kept portable/simple here.
    semantics = ("arbitrary",) if steps == 1 else ("parallel",)

    out = pl.pallas_call(
        mlp_kernel,
        out_shape=jax.ShapeDtypeStruct((Bp, O), jnp.float32),
        grid=(steps,),
        in_specs=[
            pl.BlockSpec((tile_b, K), lambda i: (i, 0)),   # x: streamed
            pl.BlockSpec((K, H), lambda i: (0, 0)),        # W1: resident
            pl.BlockSpec((1, H), lambda i: (0, 0)),        # b1: resident
            pl.BlockSpec((H, O), lambda i: (0, 0)),        # W2: resident
            pl.BlockSpec((1, O), lambda i: (0, 0)),        # b2: resident
        ],
        out_specs=pl.BlockSpec((tile_b, O), lambda i: (i, 0)),
        compiler_params=pltpu.CompilerParams(dimension_semantics=semantics),
        cost_estimate=cost,
    )(x, w1_t, b1, w2_t, b2)

    if Bp != B:
        out = out[:B]
    return out


def init_params(key, input_size, hidden_size, out_size):
    """Deterministic init mimicking nn.Linear (uniform +/- 1/sqrt(fan_in)).
       Weights stored in [in, out] layout and biases as [1, n] rows so the
       forward pass needs no per-call reshapes/casts (everything f32)."""
    k1, k2, k3, k4 = jax.random.split(key, 4)
    lim1 = 1.0 / (input_size ** 0.5)
    lim2 = 1.0 / (hidden_size ** 0.5)
    w1_t = jax.random.uniform(k1, (input_size, hidden_size), jnp.float32,
                              minval=-lim1, maxval=lim1)
    b1 = jax.random.uniform(k2, (1, hidden_size), jnp.float32,
                            minval=-lim1, maxval=lim1)
    w2_t = jax.random.uniform(k3, (hidden_size, out_size), jnp.float32,
                              minval=-lim2, maxval=lim2)
    b2 = jax.random.uniform(k4, (1, out_size), jnp.float32,
                            minval=-lim2, maxval=lim2)
    return w1_t, b1, w2_t, b2


if __name__ == "__main__":
    # Module dims stay small (in=32, hidden=64, out=16); batch=256 gives the
    # MXU a real M dimension while still fitting a single grid step.
    batch, input_size, hidden_size, out_size = 256, 32, 64, 16

    key = jax.random.PRNGKey(0)
    kx, kp = jax.random.split(key)
    x = jax.random.normal(kx, (batch, input_size), jnp.float32)
    w1_t, b1, w2_t, b2 = init_params(kp, input_size, hidden_size, out_size)

    out = net_model_forward(x, w1_t, b1, w2_t, b2)
    out = jax.block_until_ready(out)
    assert out.shape == (batch, out_size)

    # Pure-f32 PyTorch-equivalent reference: z1 = x W1 + b1; zout = z1 W2 + b2.
    ref = (x @ w1_t + b1) @ w2_t + b2
    assert jnp.allclose(out, ref, atol=2e-2, rtol=2e-2), (
        float(jnp.max(jnp.abs(out - ref))))

    print("KERNEL_OK")
</pallas_src>

<mosaic_0001>
module attributes {stable_mosaic.version = 11 : i64} {
  func.func @mlp_kernel(%arg0: i32, %arg1: memref<256x32xf32, #tpu.memory_space<vmem>>, %arg2: memref<32x64xf32, #tpu.memory_space<vmem>>, %arg3: memref<1x64xf32, #tpu.memory_space<vmem>>, %arg4: memref<64x16xf32, #tpu.memory_space<vmem>>, %arg5: memref<1x16xf32, #tpu.memory_space<vmem>>, %arg6: memref<256x16xf32, #tpu.memory_space<vmem>>) attributes {dimension_semantics = [#tpu.dimension_semantics<arbitrary>], iteration_bounds = array<i64: 1>, scalar_prefetch = 0 : i64, scratch_operands = 0 : i64, tpu.core_type = #tpu.core_type<tc>, window_params = [{transform_indices = @transform_0, window_bounds = array<i64: 256, 32>}, {pipeline_mode = #tpu.pipeline_mode<synchronous>, transform_indices = @transform_1, window_bounds = array<i64: 32, 64>}, {pipeline_mode = #tpu.pipeline_mode<synchronous>, transform_indices = @transform_2, window_bounds = array<i64: 1, 64>}, {pipeline_mode = #tpu.pipeline_mode<synchronous>, transform_indices = @transform_3, window_bounds = array<i64: 64, 16>}, {pipeline_mode = #tpu.pipeline_mode<synchronous>, transform_indices = @transform_4, window_bounds = array<i64: 1, 16>}, {transform_indices = @transform_5, window_bounds = array<i64: 256, 16>}]} {
    %c0 = arith.constant 0 : index
    %c0_0 = arith.constant 0 : index
    %0 = vector.load %arg1[%c0, %c0_0] : memref<256x32xf32, #tpu.memory_space<vmem>>, vector<256x32xf32>
    %c0_1 = arith.constant 0 : index
    %c0_2 = arith.constant 0 : index
    %1 = vector.load %arg2[%c0_1, %c0_2] : memref<32x64xf32, #tpu.memory_space<vmem>>, vector<32x64xf32>
    %cst = arith.constant dense<0.000000e+00> : vector<256x64xf32>
    %2 = tpu.matmul %0, %1, %cst {dimension_numbers = #tpu.dot_dimension_numbers<[1], [0], [0], [1], [0, 0, 1, 1], [], []>} : vector<256x32xf32>, vector<32x64xf32>, vector<256x64xf32> -> vector<256x64xf32>
    %c0_3 = arith.constant 0 : index
    %c0_4 = arith.constant 0 : index
    %3 = vector.load %arg3[%c0_3, %c0_4] : memref<1x64xf32, #tpu.memory_space<vmem>>, vector<1x64xf32>
    %4 = vector.broadcast %3 : vector<1x64xf32> to vector<256x64xf32>
    %5 = arith.addf %2, %4 : vector<256x64xf32>
    %c0_5 = arith.constant 0 : index
    %c0_6 = arith.constant 0 : index
    %6 = vector.load %arg4[%c0_5, %c0_6] : memref<64x16xf32, #tpu.memory_space<vmem>>, vector<64x16xf32>
    %cst_7 = arith.constant dense<0.000000e+00> : vector<256x16xf32>
    %7 = tpu.matmul %5, %6, %cst_7 {dimension_numbers = #tpu.dot_dimension_numbers<[1], [0], [0], [1], [0, 0, 1, 1], [], []>} : vector<256x64xf32>, vector<64x16xf32>, vector<256x16xf32> -> vector<256x16xf32>
    %c0_8 = arith.constant 0 : index
    %c0_9 = arith.constant 0 : index
    %8 = vector.load %arg5[%c0_8, %c0_9] : memref<1x16xf32, #tpu.memory_space<vmem>>, vector<1x16xf32>
    %9 = vector.broadcast %8 : vector<1x16xf32> to vector<256x16xf32>
    %10 = arith.addf %7, %9 : vector<256x16xf32>
    %c0_10 = arith.constant 0 : index
    %c0_11 = arith.constant 0 : index
    %11 = vector.load %arg6[%c0_10, %c0_11] : memref<256x16xf32, #tpu.memory_space<vmem>>, vector<256x16xf32>
    tpu.vector_store %arg6[%c0_10, %c0_11], %10 {strides = array<i32>} : memref<256x16xf32, #tpu.memory_space<vmem>>, vector<256x16xf32>,
    return
  }
  func.func @transform_0(%arg0: i32) -> (i32, i32) {
    %c0_i32 = arith.constant 0 : i32
    %c0_i32_0 = arith.constant 0 : i32
    return %arg0, %c0_i32 : i32, i32
  }
  func.func @transform_1(%arg0: i32) -> (i32, i32) {
    %c0_i32 = arith.constant 0 : i32
    %c0_i32_0 = arith.constant 0 : i32
    %c0_i32_1 = arith.constant 0 : i32
    return %c0_i32, %c0_i32_0 : i32, i32
  }
  func.func @transform_2(%arg0: i32) -> (i32, i32) {
    %c0_i32 = arith.constant 0 : i32
    %c0_i32_0 = arith.constant 0 : i32
    %c0_i32_1 = arith.constant 0 : i32
    return %c0_i32, %c0_i32_0 : i32, i32
  }
  func.func @transform_3(%arg0: i32) -> (i32, i32) {
    %c0_i32 = arith.constant 0 : i32
    %c0_i32_0 = arith.constant 0 : i32
    %c0_i32_1 = arith.constant 0 : i32
    return %c0_i32, %c0_i32_0 : i32, i32
  }
  func.func @transform_4(%arg0: i32) -> (i32, i32) {
    %c0_i32 = arith.constant 0 : i32
    %c0_i32_0 = arith.constant 0 : i32
    %c0_i32_1 = arith.constant 0 : i32
    return %c0_i32, %c0_i32_0 : i32, i32
  }
  func.func @transform_5(%arg0: i32) -> (i32, i32) {
    %c0_i32 = arith.constant 0 : i32
    %c0_i32_0 = arith.constant 0 : i32
    return %arg0, %c0_i32 : i32, i32
  }
}

</mosaic_0001>

<bundles_post_ra>
// kernel: tpu_custom_call.1
= control target key start
LH: loop header
LB: loop body
LE: loop exit
PB: predicated region body
PF: predicated region fallthrough
CT: control target
= control target key end

     0   :  { %vm60_vm0 = vcmask 261120   ;;  %vm282_vm1 = vcmask 523264   ;;  %vm492_vm2 = vcmask 130048   ;;  %s1035_s1 = inlined_call_operand.vmem [shape: f32[32,64], index: 1, kind: input, shape index: {}]   ;;  %s1036_s0 = inlined_call_operand.vmem [shape: f32[256,32], index: 0, kind: input, shape index: {}]   ;;  %s1037_s2 = inlined_call_operand.vmem [shape: f32[1,64], index: 2, kind: input, shape index: {}]   ;;  %s1038_s3 = inlined_call_operand.vmem [shape: f32[64,16], index: 3, kind: input, shape index: {}]   ;;  %s1039_s4 = inlined_call_operand.vmem [shape: f32[1,16], index: 4, kind: input, shape index: {}]   ;;  %s1040_s5 = inlined_call_operand.vmem [shape: f32[256,16], index: 5, kind: output, shape index: {}]  }
   0x1   :  { %v55_v0 = vld [vmem:[%s1035_s1 + $0x18] sm:$0xff]  ;;  %v54_v1 = vld [vmem:[%s1035_s1 + $0x10] sm:$0xff]  ;;  %v53_v2 = vld [vmem:[%s1035_s1 + $0x8] sm:$0xff] }
   0x2   :  { %169 = vmatpush.msra.mxu0 %v55_v0  ;;  %593 = vmatpush.msra.mxu3 %v55_v0  ;;  %v52_v3 = vld [vmem:[%s1035_s1] sm:$0xff]  ;;  %v21_v5 = vld [vmem:[%s1036_s0 + $0x8] sm:$0xff]  ;;  %v22_v6 = vld [vmem:[%s1036_s0 + $0x10] sm:$0xff] }
   0x3   :  { %v20_v4 = vld [vmem:[%s1036_s0] sm:$0xff]  ;;  %v23_v7 = vld [vmem:[%s1036_s0 + $0x18] sm:$0xff]  ;;  %v25_v9 = vld [vmem:[%s1036_s0 + $0x28] sm:$0xff] }
   0x4   :  { %170 = vmatpush.msra.mxu0 %v54_v1  ;;  %594 = vmatpush.msra.mxu3 %v54_v1  ;;  %v24_v8 = vld [vmem:[%s1036_s0 + $0x20] sm:$0xff]  ;;  %v26_v10 = vld [vmem:[%s1036_s0 + $0x30] sm:$0xff]  ;;  %v27_v11 = vld [vmem:[%s1036_s0 + $0x38] sm:$0xff] }
   0x5   :  { %v28_v12 = vld [vmem:[%s1036_s0 + $0x40] sm:$0xff]  ;;  %v29_v13 = vld [vmem:[%s1036_s0 + $0x48] sm:$0xff]  ;;  %v30_v14 = vld [vmem:[%s1036_s0 + $0x50] sm:$0xff] }
   0x6   :  { %171 = vmatpush.msra.mxu0 %v53_v2  ;;  %595 = vmatpush.msra.mxu3 %v53_v2  ;;  %v277_v15 = vld [vmem:[%s1038_s3 + $0x38] sm:$0xff]  ;;  %v276_v16 = vld [vmem:[%s1038_s3 + $0x30] sm:$0xff]  ;;  %v275_v17 = vld [vmem:[%s1038_s3 + $0x28] sm:$0xff] }
   0x7   :  { %387 = vmatpush.msra.mxu1 %v277_v15  ;;  %597 = vmatpush.msra.mxu2 %v277_v15  ;;  %v274_v18 = vld [vmem:[%s1038_s3 + $0x20] sm:$0xff]  ;;  %v31_v19 = vld [vmem:[%s1036_s0 + $0x58] sm:$0xff]  ;;  %v272_v21 = vld [vmem:[%s1038_s3 + $0x10] sm:$0xff] }
   0x8   :  { %172 = vmatpush.msra.mxu0 %v52_v3  ;;  %596 = vmatpush.msra.mxu3 %v52_v3  ;;  %v273_v20 = vld [vmem:[%s1038_s3 + $0x18] sm:$0xff]  ;;  %v271_v22 = vld [vmem:[%s1038_s3 + $0x8] sm:$0xff]  ;;  %v32_v23 = vld [vmem:[%s1036_s0 + $0x60] sm:$0xff] }
   0x9   :  { %529 = vmatmul.msk.f32.vlgmr.msra.gmra.mxu0 %vm60_vm0, %v20_v4  ;;  %388 = vmatpush.msra.mxu1 %v276_v16  ;;  %v270_v24 = vld [vmem:[%s1038_s3] sm:$0xff]  ;;  %v37_v25 = vld [vmem:[%s1036_s0 + $0x88] sm:$0xff]  ;;  %v38_v27 = vld [vmem:[%s1036_s0 + $0x90] sm:$0xff] }
   0xa   :  { %598 = vmatpush.msra.mxu2 %v276_v16  ;;  %546 = vmatmul.msk.f32.vlgmr.msra.gmra.mxu3 %vm60_vm0, %v37_v25  ;;  %v33_v26 = vld [vmem:[%s1036_s0 + $0x68] sm:$0xff]  ;;  %v34_v28 = vld [vmem:[%s1036_s0 + $0x70] sm:$0xff]  ;;  %v39_v29 = vld [vmem:[%s1036_s0 + $0x98] sm:$0xff] }
   0xb   :  { %389 = vmatpush.msra.mxu1 %v275_v17  ;;  %v35_v30 = vld [vmem:[%s1036_s0 + $0x78] sm:$0xff]  ;;  %v40_v31 = vld [vmem:[%s1036_s0 + $0xa0] sm:$0xff]  ;;  %v41_v36 = vld [vmem:[%s1036_s0 + $0xa8] sm:$0xff] }
   0xc   :  { %599 = vmatpush.msra.mxu2 %v275_v17  ;;  %v756_v32 = vld [vmem:[%s1037_s2] ss:$0 sm:$0xff]  ;;  %v42_v39 = vld [vmem:[%s1036_s0 + $0xb0] sm:$0xff]  ;;  %v43_v42 = vld [vmem:[%s1036_s0 + $0xb8] sm:$0xff] }
   0xd   :  { %390 = vmatpush.msra.mxu1 %v274_v18  ;;  %v36_v34 = vld [vmem:[%s1036_s0 + $0x80] sm:$0xff]  ;;  %v45_v48 = vld [vmem:[%s1036_s0 + $0xc8] sm:$0xff]  ;;  %v46_v51 = vld [vmem:[%s1036_s0 + $0xd0] sm:$0xff] }
   0xe   :  { %600 = vmatpush.msra.mxu2 %v274_v18  ;;  %v44_v45 = vld [vmem:[%s1036_s0 + $0xc0] sm:$0xff]  ;;  %v47_v54 = vld [vmem:[%s1036_s0 + $0xd8] sm:$0xff]  ;;  %v49_v60 = vld [vmem:[%s1036_s0 + $0xe8] sm:$0xff] }
   0xf   :  { %391 = vmatpush.msra.mxu1 %v273_v20  ;;  %v48_v57 = vld [vmem:[%s1036_s0 + $0xe0] sm:$0xff]  ;;  %v50_v63 = vld [vmem:[%s1036_s0 + $0xf0] sm:$0xff]  ;;  %v51_v2 = vld [vmem:[%s1036_s0 + $0xf8] sm:$0xff] }
  0x10   :  { %601 = vmatpush.msra.mxu2 %v273_v20  ;;  %v841_v16 = vld [vmem:[%s1039_s4] ss:$0 sm:$0xff] }
  0x11   :  { %530 = vmatmul.msk.f32.gmra.mxu0 %vm60_vm0, %v21_v5  ;;  %392 = vmatpush.msra.mxu1 %v272_v21 }
  0x12   :  { %602 = vmatpush.msra.mxu2 %v272_v21  ;;  %547 = vmatmul.msk.f32.gmra.mxu3 %vm60_vm0, %v38_v27 }
  0x13   :  { %393 = vmatpush.msra.mxu1 %v271_v22 }
  0x14   :  { %603 = vmatpush.msra.mxu2 %v271_v22 }
  0x15   :  { %394 = vmatpush.msra.mxu1 %v270_v24 }
  0x16   :  { %604 = vmatpush.msra.mxu2 %v270_v24 }
  0x19   :  { %531 = vmatmul.msk.f32.gmra.mxu0 %vm60_vm0, %v22_v6 }
  0x1a   :  { %548 = vmatmul.msk.f32.gmra.mxu3 %vm60_vm0, %v39_v29 }
  0x21   :  { %532 = vmatmul.msk.f32.gmra.mxu0 %vm60_vm0, %v23_v7 }
  0x22   :  { %549 = vmatmul.msk.f32.gmra.mxu3 %vm60_vm0, %v40_v31 }
  0x29   :  { %533 = vmatmul.msk.f32.gmra.mxu0 %vm60_vm0, %v24_v8 }
  0x2a   :  { %550 = vmatmul.msk.f32.gmra.mxu3 %vm60_vm0, %v41_v36 }
  0x31   :  { %534 = vmatmul.msk.f32.gmra.mxu0 %vm60_vm0, %v25_v9 }
  0x32   :  { %551 = vmatmul.msk.f32.gmra.mxu3 %vm60_vm0, %v42_v39 }
  0x39   :  { %535 = vmatmul.msk.f32.gmra.mxu0 %vm60_vm0, %v26_v10 }
  0x3a   :  { %552 = vmatmul.msk.f32.gmra.mxu3 %vm60_vm0, %v43_v42 }
  0x41   :  { %536 = vmatmul.msk.f32.gmra.mxu0 %vm60_vm0, %v27_v11 }
  0x42   :  { %553 = vmatmul.msk.f32.gmra.mxu3 %vm60_vm0, %v44_v45 }
  0x49   :  { %537 = vmatmul.msk.f32.gmra.mxu0 %vm60_vm0, %v28_v12 }
  0x4a   :  { %554 = vmatmul.msk.f32.gmra.mxu3 %vm60_vm0, %v45_v48 }
  0x51   :  { %538 = vmatmul.msk.f32.gmra.mxu0 %vm60_vm0, %v29_v13 }
  0x52   :  { %555 = vmatmul.msk.f32.gmra.mxu3 %vm60_vm0, %v46_v51 }
  0x59   :  { %539 = vmatmul.msk.f32.gmra.mxu0 %vm60_vm0, %v30_v14 }
  0x5a   :  { %556 = vmatmul.msk.f32.gmra.mxu3 %vm60_vm0, %v47_v54 }
  0x61   :  { %540 = vmatmul.msk.f32.gmra.mxu0 %vm60_vm0, %v31_v19 }
  0x62   :  { %557 = vmatmul.msk.f32.gmra.mxu3 %vm60_vm0, %v48_v57 }
  0x69   :  { %541 = vmatmul.msk.f32.gmra.mxu0 %vm60_vm0, %v32_v23 }
  0x6a   :  { %558 = vmatmul.msk.f32.gmra.mxu3 %vm60_vm0, %v49_v60 }
  0x71   :  { %542 = vmatmul.msk.f32.gmra.mxu0 %vm60_vm0, %v33_v26 }
  0x72   :  { %559 = vmatmul.msk.f32.gmra.mxu3 %vm60_vm0, %v50_v63 }
  0x79   :  { %543 = vmatmul.msk.f32.gmra.mxu0 %vm60_vm0, %v34_v28 }
  0x7a   :  { %560 = vmatmul.msk.f32.gmra.mxu3 %vm60_vm0, %v51_v2 }
  0x81   :  { %544 = vmatmul.msk.f32.gmra.mxu0 %vm60_vm0, %v35_v30 }
  0x86   :  { %v174_v33 = vpop.f32.mrf.mxu0 }
  0x87   :  { %v175_v35 = vadd.f32 %v756_v32, %v174_v33 }
  0x89   :  { %545 = vmatmul.msk.f32.gmra.mxu0 %vm60_vm0, %v36_v34  ;;  %561 = vmatmul.msk.f32.vlgmr.msra.gmra.mxu1 %vm282_vm1, %v175_v35 }
  0x8d   :  { %v225_v8 = vpop.f32.mrf.mxu3 }
  0x8e   :  { %v177_v37 = vpop.f32.mrf.mxu0  ;;  %v226_v22 = vadd.f32 %v756_v32, %v225_v8 }
  0x8f   :  { %v178_v38 = vadd.f32 %v756_v32, %v177_v37 }
  0x91   :  { %562 = vmatmul.msk.f32.gmra.mxu1 %vm282_vm1, %v178_v38 }
  0x95   :  { %v228_v12 = vpop.f32.mrf.mxu3 }
  0x96   :  { %v180_v40 = vpop.f32.mrf.mxu0  ;;  %v229_v25 = vadd.f32 %v756_v32, %v228_v12 }
  0x97   :  { %v181_v41 = vadd.f32 %v756_v32, %v180_v40 }
  0x99   :  { %563 = vmatmul.msk.f32.gmra.mxu1 %vm282_vm1, %v181_v41 }
  0x9d   :  { %v231_v15 = vpop.f32.mrf.mxu3 }
  0x9e   :  { %v183_v43 = vpop.f32.mrf.mxu0  ;;  %v232_v29 = vadd.f32 %v756_v32, %v231_v15 }
  0x9f   :  { %v184_v44 = vadd.f32 %v756_v32, %v183_v43 }
  0xa1   :  { %564 = vmatmul.msk.f32.gmra.mxu1 %vm282_vm1, %v184_v44 }
  0xa5   :  { %v234_v21 = vpop.f32.mrf.mxu3 }
  0xa6   :  { %v186_v46 = vpop.f32.mrf.mxu0  ;;  %v235_v34 = vadd.f32 %v756_v32, %v234_v21 }
  0xa7   :  { %v187_v47 = vadd.f32 %v756_v32, %v186_v46 }
  0xa9   :  { %565 = vmatmul.msk.f32.gmra.mxu1 %vm282_vm1, %v187_v47 }
  0xad   :  { %v237_v27 = vpop.f32.mrf.mxu3 }
  0xae   :  { %v189_v49 = vpop.f32.mrf.mxu0  ;;  %v238_v38 = vadd.f32 %v756_v32, %v237_v27 }
  0xaf   :  { %v190_v50 = vadd.f32 %v756_v32, %v189_v49 }
  0xb1   :  { %566 = vmatmul.msk.f32.gmra.mxu1 %vm282_vm1, %v190_v50 }
  0xb5   :  { %v240_v33 = vpop.f32.mrf.mxu3 }
  0xb6   :  { %v192_v52 = vpop.f32.mrf.mxu0  ;;  %v241_v42 = vadd.f32 %v756_v32, %v240_v33 }
  0xb7   :  { %v193_v53 = vadd.f32 %v756_v32, %v192_v52 }
  0xb9   :  { %567 = vmatmul.msk.f32.gmra.mxu1 %vm282_vm1, %v193_v53 }
  0xbd   :  { %v243_v37 = vpop.f32.mrf.mxu3 }
  0xbe   :  { %v195_v55 = vpop.f32.mrf.mxu0  ;;  %v244_v45 = vadd.f32 %v756_v32, %v243_v37 }
  0xbf   :  { %v196_v56 = vadd.f32 %v756_v32, %v195_v55 }
  0xc1   :  { %568 = vmatmul.msk.f32.gmra.mxu1 %vm282_vm1, %v196_v56 }
  0xc5   :  { %v246_v41 = vpop.f32.mrf.mxu3 }
  0xc6   :  { %v198_v58 = vpop.f32.mrf.mxu0  ;;  %v247_v49 = vadd.f32 %v756_v32, %v246_v41 }
  0xc7   :  { %v199_v59 = vadd.f32 %v756_v32, %v198_v58 }
  0xc9   :  { %569 = vmatmul.msk.f32.gmra.mxu1 %vm282_vm1, %v199_v59 }
  0xcd   :  { %v249_v47 = vpop.f32.mrf.mxu3 }
  0xce   :  { %v201_v61 = vpop.f32.mrf.mxu0  ;;  %v250_v53 = vadd.f32 %v756_v32, %v249_v47 }
  0xcf   :  { %v202_v62 = vadd.f32 %v756_v32, %v201_v61 }
  0xd1   :  { %570 = vmatmul.msk.f32.gmra.mxu1 %vm282_vm1, %v202_v62 }
  0xd5   :  { %v252_v52 = vpop.f32.mrf.mxu3 }
  0xd6   :  { %v204_v0 = vpop.f32.mrf.mxu0  ;;  %v253_v57 = vadd.f32 %v756_v32, %v252_v52 }
  0xd7   :  { %v205_v1 = vadd.f32 %v756_v32, %v204_v0 }
  0xd9   :  { %571 = vmatmul.msk.f32.gmra.mxu1 %vm282_vm1, %v205_v1 }
  0xdd   :  { %v255_v56 = vpop.f32.mrf.mxu3 }
  0xde   :  { %v207_v3 = vpop.f32.mrf.mxu0  ;;  %v256_v61 = vadd.f32 %v756_v32, %v255_v56 }
  0xdf   :  { %v208_v4 = vadd.f32 %v756_v32, %v207_v3 }
  0xe1   :  { %572 = vmatmul.msk.f32.gmra.mxu1 %vm282_vm1, %v208_v4 }
  0xe5   :  { %v258_v60 = vpop.f32.mrf.mxu3 }
  0xe6   :  { %v210_v5 = vpop.f32.mrf.mxu0  ;;  %v259_v0 = vadd.f32 %v756_v32, %v258_v60 }
  0xe7   :  { %v211_v6 = vadd.f32 %v756_v32, %v210_v5 }
  0xe9   :  { %573 = vmatmul.msk.f32.gmra.mxu1 %vm282_vm1, %v211_v6 }
  0xed   :  { %v261_v2 = vpop.f32.mrf.mxu3 }
  0xee   :  { %v213_v7 = vpop.f32.mrf.mxu0  ;;  %v262_v4 = vadd.f32 %v756_v32, %v261_v2 }
  0xef   :  { %v214_v9 = vadd.f32 %v756_v32, %v213_v7 }
  0xf1   :  { %574 = vmatmul.msk.f32.gmra.mxu1 %vm282_vm1, %v214_v9 }
  0xf5   :  { %v264_v7 = vpop.f32.mrf.mxu3 }
  0xf6   :  { %v216_v10 = vpop.f32.mrf.mxu0  ;;  %v265_v8 = vadd.f32 %v756_v32, %v264_v7 }
  0xf7   :  { %v217_v11 = vadd.f32 %v756_v32, %v216_v10 }
  0xf9   :  { %575 = vmatmul.msk.f32.gmra.mxu1 %vm282_vm1, %v217_v11 }
  0xfd   :  { %v267_v11 = vpop.f32.mrf.mxu3 }
  0xfe   :  { %v219_v13 = vpop.f32.mrf.mxu0  ;;  %v268_v12 = vadd.f32 %v756_v32, %v267_v11 }
  0xff   :  { %v220_v14 = vadd.f32 %v756_v32, %v219_v13 }
 0x101   :  { %576 = vmatmul.msk.f32.gmra.mxu1 %vm282_vm1, %v220_v14 }
 0x106   :  { %v222_v17 = vpop.f32.mrf.mxu0  ;;  %v396_v18 = vpop.f32.mrf.mxu1 }
 0x107   :  { %v223_v19 = vadd.f32 %v756_v32, %v222_v17  ;;  %v397_v20 = vadd.f32 %v841_v16, %v396_v18 }
 0x109   :  { %493 = vst.msk [vmem:[%s1040_s5] sm:$0xff] %vm492_vm2, %v397_v20  ;;  %577 = vmatmul.msk.f32.vlgmr.msra.gmra.mxu2 %vm282_vm1, %v223_v19 }
 0x10e   :  { %v399_v23 = vpop.f32.mrf.mxu1 }
 0x10f   :  { %v400_v24 = vadd.f32 %v841_v16, %v399_v23 }
 0x111   :  { %494 = vst.msk [vmem:[%s1040_s5 + $0x8] sm:$0xff] %vm492_vm2, %v400_v24  ;;  %578 = vmatmul.msk.f32.gmra.mxu2 %vm282_vm1, %v226_v22 }
 0x116   :  { %v402_v26 = vpop.f32.mrf.mxu1 }
 0x117   :  { %v403_v28 = vadd.f32 %v841_v16, %v402_v26 }
 0x119   :  { %495 = vst.msk [vmem:[%s1040_s5 + $0x10] sm:$0xff] %vm492_vm2, %v403_v28  ;;  %579 = vmatmul.msk.f32.gmra.mxu2 %vm282_vm1, %v229_v25 }
 0x11e   :  { %v405_v30 = vpop.f32.mrf.mxu1 }
 0x11f   :  { %v406_v31 = vadd.f32 %v841_v16, %v405_v30 }
 0x121   :  { %496 = vst.msk [vmem:[%s1040_s5 + $0x18] sm:$0xff] %vm492_vm2, %v406_v31  ;;  %580 = vmatmul.msk.f32.gmra.mxu2 %vm282_vm1, %v232_v29 }
 0x126   :  { %v408_v35 = vpop.f32.mrf.mxu1 }
 0x127   :  { %v409_v36 = vadd.f32 %v841_v16, %v408_v35 }
 0x129   :  { %497 = vst.msk [vmem:[%s1040_s5 + $0x20] sm:$0xff] %vm492_vm2, %v409_v36  ;;  %581 = vmatmul.msk.f32.gmra.mxu2 %vm282_vm1, %v235_v34 }
 0x12e   :  { %v411_v39 = vpop.f32.mrf.mxu1 }
 0x12f   :  { %v412_v40 = vadd.f32 %v841_v16, %v411_v39 }
 0x131   :  { %498 = vst.msk [vmem:[%s1040_s5 + $0x28] sm:$0xff] %vm492_vm2, %v412_v40  ;;  %582 = vmatmul.msk.f32.gmra.mxu2 %vm282_vm1, %v238_v38 }
 0x136   :  { %v414_v43 = vpop.f32.mrf.mxu1 }
 0x137   :  { %v415_v44 = vadd.f32 %v841_v16, %v414_v43 }
 0x139   :  { %499 = vst.msk [vmem:[%s1040_s5 + $0x30] sm:$0xff] %vm492_vm2, %v415_v44  ;;  %583 = vmatmul.msk.f32.gmra.mxu2 %vm282_vm1, %v241_v42 }
 0x13e   :  { %v417_v46 = vpop.f32.mrf.mxu1 }
 0x13f   :  { %v418_v48 = vadd.f32 %v841_v16, %v417_v46 }
 0x141   :  { %500 = vst.msk [vmem:[%s1040_s5 + $0x38] sm:$0xff] %vm492_vm2, %v418_v48  ;;  %584 = vmatmul.msk.f32.gmra.mxu2 %vm282_vm1, %v244_v45 }
 0x146   :  { %v420_v50 = vpop.f32.mrf.mxu1 }
 0x147   :  { %v421_v51 = vadd.f32 %v841_v16, %v420_v50 }
 0x149   :  { %501 = vst.msk [vmem:[%s1040_s5 + $0x40] sm:$0xff] %vm492_vm2, %v421_v51  ;;  %585 = vmatmul.msk.f32.gmra.mxu2 %vm282_vm1, %v247_v49 }
 0x14e   :  { %v423_v54 = vpop.f32.mrf.mxu1 }
 0x14f   :  { %v424_v55 = vadd.f32 %v841_v16, %v423_v54 }
 0x151   :  { %502 = vst.msk [vmem:[%s1040_s5 + $0x48] sm:$0xff] %vm492_vm2, %v424_v55  ;;  %586 = vmatmul.msk.f32.gmra.mxu2 %vm282_vm1, %v250_v53 }
 0x156   :  { %v426_v58 = vpop.f32.mrf.mxu1 }
 0x157   :  { %v427_v59 = vadd.f32 %v841_v16, %v426_v58 }
 0x159   :  { %503 = vst.msk [vmem:[%s1040_s5 + $0x50] sm:$0xff] %vm492_vm2, %v427_v59  ;;  %587 = vmatmul.msk.f32.gmra.mxu2 %vm282_vm1, %v253_v57 }
 0x15e   :  { %v429_v62 = vpop.f32.mrf.mxu1 }
 0x15f   :  { %v430_v63 = vadd.f32 %v841_v16, %v429_v62 }
 0x161   :  { %504 = vst.msk [vmem:[%s1040_s5 + $0x58] sm:$0xff] %vm492_vm2, %v430_v63  ;;  %588 = vmatmul.msk.f32.gmra.mxu2 %vm282_vm1, %v256_v61 }
 0x166   :  { %v432_v1 = vpop.f32.mrf.mxu1 }
 0x167   :  { %v433_v3 = vadd.f32 %v841_v16, %v432_v1 }
 0x169   :  { %505 = vst.msk [vmem:[%s1040_s5 + $0x60] sm:$0xff] %vm492_vm2, %v433_v3  ;;  %589 = vmatmul.msk.f32.gmra.mxu2 %vm282_vm1, %v259_v0 }
 0x16e   :  { %v435_v5 = vpop.f32.mrf.mxu1 }
 0x16f   :  { %v436_v6 = vadd.f32 %v841_v16, %v435_v5 }
 0x171   :  { %506 = vst.msk [vmem:[%s1040_s5 + $0x68] sm:$0xff] %vm492_vm2, %v436_v6  ;;  %590 = vmatmul.msk.f32.gmra.mxu2 %vm282_vm1, %v262_v4 }
 0x176   :  { %v438_v9 = vpop.f32.mrf.mxu1 }
 0x177   :  { %v439_v10 = vadd.f32 %v841_v16, %v438_v9 }
 0x179   :  { %507 = vst.msk [vmem:[%s1040_s5 + $0x70] sm:$0xff] %vm492_vm2, %v439_v10  ;;  %591 = vmatmul.msk.f32.gmra.mxu2 %vm282_vm1, %v265_v8 }
 0x17e   :  { %v441_v13 = vpop.f32.mrf.mxu1 }
 0x17f   :  { %v442_v14 = vadd.f32 %v841_v16, %v441_v13 }
 0x181   :  { %508 = vst.msk [vmem:[%s1040_s5 + $0x78] sm:$0xff] %vm492_vm2, %v442_v14  ;;  %592 = vmatmul.msk.f32.gmra.mxu2 %vm282_vm1, %v268_v12 }
 0x18c   :  { %v444_v15 = vpop.f32.mrf.mxu2 }
 0x18d   :  { %v445_v17 = vadd.f32 %v841_v16, %v444_v15 }
 0x18f   :  { %509 = vst.msk [vmem:[%s1040_s5 + $0x80] sm:$0xff] %vm492_vm2, %v445_v17 }
 0x194   :  { %v447_v18 = vpop.f32.mrf.mxu2 }
 0x195   :  { %v448_v32 = vadd.f32 %v841_v16, %v447_v18 }
 0x197   :  { %510 = vst.msk [vmem:[%s1040_s5 + $0x88] sm:$0xff] %vm492_vm2, %v448_v32 }
 0x19c   :  { %v450_v19 = vpop.f32.mrf.mxu2 }
 0x19d   :  { %v451_v20 = vadd.f32 %v841_v16, %v450_v19 }
 0x19f   :  { %511 = vst.msk [vmem:[%s1040_s5 + $0x90] sm:$0xff] %vm492_vm2, %v451_v20 }
 0x1a4   :  { %v453_v21 = vpop.f32.mrf.mxu2 }
 0x1a5   :  { %v454_v22 = vadd.f32 %v841_v16, %v453_v21 }
 0x1a7   :  { %512 = vst.msk [vmem:[%s1040_s5 + $0x98] sm:$0xff] %vm492_vm2, %v454_v22 }
 0x1ac   :  { %v456_v23 = vpop.f32.mrf.mxu2 }
 0x1ad   :  { %v457_v24 = vadd.f32 %v841_v16, %v456_v23 }
 0x1af   :  { %513 = vst.msk [vmem:[%s1040_s5 + $0xa0] sm:$0xff] %vm492_vm2, %v457_v24 }
 0x1b4   :  { %v459_v25 = vpop.f32.mrf.mxu2 }
 0x1b5   :  { %v460_v26 = vadd.f32 %v841_v16, %v459_v25 }
 0x1b7   :  { %514 = vst.msk [vmem:[%s1040_s5 + $0xa8] sm:$0xff] %vm492_vm2, %v460_v26 }
 0x1bc   :  { %v462_v27 = vpop.f32.mrf.mxu2 }
 0x1bd   :  { %v463_v28 = vadd.f32 %v841_v16, %v462_v27 }
 0x1bf   :  { %515 = vst.msk [vmem:[%s1040_s5 + $0xb0] sm:$0xff] %vm492_vm2, %v463_v28 }
 0x1c4   :  { %v465_v29 = vpop.f32.mrf.mxu2 }
 0x1c5   :  { %v466_v30 = vadd.f32 %v841_v16, %v465_v29 }
 0x1c7   :  { %516 = vst.msk [vmem:[%s1040_s5 + $0xb8] sm:$0xff] %vm492_vm2, %v466_v30 }
 0x1cc   :  { %v468_v31 = vpop.f32.mrf.mxu2 }
 0x1cd   :  { %v469_v33 = vadd.f32 %v841_v16, %v468_v31 }
 0x1cf   :  { %517 = vst.msk [vmem:[%s1040_s5 + $0xc0] sm:$0xff] %vm492_vm2, %v469_v33 }
 0x1d4   :  { %v471_v34 = vpop.f32.mrf.mxu2 }
 0x1d5   :  { %v472_v35 = vadd.f32 %v841_v16, %v471_v34 }
 0x1d7   :  { %518 = vst.msk [vmem:[%s1040_s5 + $0xc8] sm:$0xff] %vm492_vm2, %v472_v35 }
 0x1dc   :  { %v474_v36 = vpop.f32.mrf.mxu2 }
 0x1dd   :  { %v475_v37 = vadd.f32 %v841_v16, %v474_v36 }
 0x1df   :  { %519 = vst.msk [vmem:[%s1040_s5 + $0xd0] sm:$0xff] %vm492_vm2, %v475_v37 }
 0x1e4   :  { %v477_v38 = vpop.f32.mrf.mxu2 }
 0x1e5   :  { %v478_v39 = vadd.f32 %v841_v16, %v477_v38 }
 0x1e7   :  { %520 = vst.msk [vmem:[%s1040_s5 + $0xd8] sm:$0xff] %vm492_vm2, %v478_v39 }
 0x1ec   :  { %v480_v40 = vpop.f32.mrf.mxu2 }
 0x1ed   :  { %v481_v41 = vadd.f32 %v841_v16, %v480_v40 }
 0x1ef   :  { %521 = vst.msk [vmem:[%s1040_s5 + $0xe0] sm:$0xff] %vm492_vm2, %v481_v41 }
 0x1f4   :  { %v483_v42 = vpop.f32.mrf.mxu2 }
 0x1f5   :  { %v484_v43 = vadd.f32 %v841_v16, %v483_v42 }
 0x1f7   :  { %522 = vst.msk [vmem:[%s1040_s5 + $0xe8] sm:$0xff] %vm492_vm2, %v484_v43 }
 0x1fc   :  { %v486_v44 = vpop.f32.mrf.mxu2 }
 0x1fd   :  { %v487_v45 = vadd.f32 %v841_v16, %v486_v44 }
 0x1ff   :  { %523 = vst.msk [vmem:[%s1040_s5 + $0xf0] sm:$0xff] %vm492_vm2, %v487_v45 }
 0x204   :  { %v489_v46 = vpop.f32.mrf.mxu2 }
 0x205   :  { %v490_v47 = vadd.f32 %v841_v16, %v489_v46 }
 0x207   :  { %524 = vst.msk [vmem:[%s1040_s5 + $0xf8] sm:$0xff] %vm492_vm2, %v490_v47 }

</bundles_post_ra>
